<compile_context>
chip_gen: v5e
topology: v5e:2x2
jax: 0.10.0
libtpu: 0.0.40
codegen_flags: <defaults>
</compile_context>

<pallas_src>
import jax
import jax.numpy as jnp
from jax.experimental import pallas as pl
from jax.experimental.pallas import tpu as pltpu

HIDDEN = 32
PITCH_INPUT_SIZE = 63
DUR_INPUT_SIZE = 20
PITCH_EMB = 16
DUR_EMB = 16
INPUT_SIZE = PITCH_EMB + DUR_EMB  # 32
GATES = 4 * HIDDEN                # 128 (one vreg lane-width)


def note_encoder_seq_kernel(idx_ref,            # SMEM (2, T) int32: [pitch_row; dur_row]
                            pgate_ref,          # (63, 128) f32: pitch_emb @ Wih_p^T + (b_ih+b_hh)
                            dgate_ref,          # (20, 128) f32: dur_emb   @ Wih_d^T
                            whh_ref,            # (H, 4H) = (32, 128)
                            h0c0_ref,           # (1, 4H) = [h0 | c0 | pad]
                            out_ref):           # (T, 4H): row t = [h_t | c_t | pad]
    T = out_ref.shape[0]
    H = HIDDEN

    # Hoist weight load / constants out of the recurrence loop.
    whh = whh_ref[...]
    pad = jnp.zeros((1, 2 * H), jnp.float32)

    h0 = h0c0_ref[:, 0:H]
    c0 = h0c0_ref[:, H:2 * H]

    def step(t, carry):
        h, c = carry
        p = idx_ref[0, t]
        d = idx_ref[1, t]

        # Lane-dense (1, 128) gathers of the precomputed input-projection rows.
        gp = pgate_ref[pl.ds(p, 1), :]                    # bias already folded in
        gd = dgate_ref[pl.ds(d, 1), :]

        # gates = x @ W_ih^T + b_ih + b_hh + h @ W_hh^T  (only the recurrent
        # matmul remains in-kernel; everything else was folded into the tables)
        gates = gp + gd + jnp.dot(h, whh, preferred_element_type=jnp.float32)

        # Whole-vreg nonlinearities, then lane slices (torch gate order i,f,g,o).
        sig = jax.nn.sigmoid(gates)
        tnh = jnp.tanh(gates)
        i_g = sig[:, 0:H]
        f_g = sig[:, H:2 * H]
        g_g = tnh[:, 2 * H:3 * H]
        o_g = sig[:, 3 * H:4 * H]

        c_new = f_g * c + i_g * g_g
        h_new = o_g * jnp.tanh(c_new)

        # Lane-dense 128-wide store of [h_t | c_t | pad].
        out_ref[pl.ds(t, 1), :] = jnp.concatenate([h_new, c_new, pad], axis=-1)
        return (h_new, c_new)

    # Fully unroll short recurrences (static sublane offsets, LLO visibility).
    jax.lax.fori_loop(0, T, step, (h0, c0), unroll=(T <= 16))


def _full_spec(shape):
    nd = len(shape)
    return pl.BlockSpec(shape, lambda i, idx, _nd=nd: (0,) * _nd)


def prepare_params(params):
    """One-time layout/precompute prep (hoisted off the per-call path).

    Fuses the embedding lookup with the LSTM input projection:
      x @ W_ih^T = pitch_emb[p] @ W_ih[:, :16]^T + dur_emb[d] @ W_ih[:, 16:]^T
    so the kernel only gathers precomputed (1, 128) gate rows.
    """
    hp = jax.lax.Precision.HIGHEST
    w_ih_t = params["weight_ih"].astype(jnp.float32).T            # (INPUT_SIZE, 4H)
    b = (params["bias_ih"] + params["bias_hh"]).astype(jnp.float32).reshape(1, GATES)
    pitch_gate = jnp.dot(params["pitch_embedding"].astype(jnp.float32),
                         w_ih_t[:PITCH_EMB, :], precision=hp) + b  # (63, 4H), bias folded
    dur_gate = jnp.dot(params["dur_embedding"].astype(jnp.float32),
                       w_ih_t[PITCH_EMB:, :], precision=hp)        # (20, 4H)
    return {
        "pitch_gate": pitch_gate,
        "dur_gate": dur_gate,
        "whh": params["weight_hh"].astype(jnp.float32).T,          # (H, 4H)
    }


def _run_kernel(idx_2xT, hn, cn, pp):
    T = idx_2xT.shape[1]
    h0c0 = jnp.concatenate(
        [hn.reshape(1, HIDDEN).astype(jnp.float32),
         cn.reshape(1, HIDDEN).astype(jnp.float32),
         jnp.zeros((1, 2 * HIDDEN), jnp.float32)], axis=-1)        # (1, 4H)

    grid_spec = pltpu.PrefetchScalarGridSpec(
        num_scalar_prefetch=1,
        grid=(1,),
        in_specs=[
            _full_spec(pp["pitch_gate"].shape),
            _full_spec(pp["dur_gate"].shape),
            _full_spec(pp["whh"].shape),
            _full_spec(h0c0.shape),
        ],
        out_specs=_full_spec((T, GATES)),
    )

    return pl.pallas_call(
        note_encoder_seq_kernel,
        out_shape=jax.ShapeDtypeStruct((T, GATES), jnp.float32),
        grid_spec=grid_spec,
        compiler_params=pltpu.CompilerParams(
            dimension_semantics=("arbitrary",)),
    )(idx_2xT, pp["pitch_gate"], pp["dur_gate"], pp["whh"], h0c0)


def note_encoder_sequence(notes, hn, cn, pp):
    """notes: int32 (T, 2) rows [pitch_idx, dur_idx]; hn, cn: (1, 1, H).
    Equivalent to calling the single-step module T times, feeding back (hn, cn).
    Returns (h_seq (T, H), (hn (1,1,H), cn (1,1,H)))."""
    idx = notes.astype(jnp.int32).T                       # (2, T): long axis last (SMEM padding)
    out = _run_kernel(idx, hn, cn, pp)                    # (T, 4H) = [h | c | pad] per row
    h_seq = out[:, :HIDDEN]
    hn_new = out[-1, :HIDDEN].reshape(1, 1, HIDDEN)
    cn_new = out[-1, HIDDEN:2 * HIDDEN].reshape(1, 1, HIDDEN)
    return h_seq, (hn_new, cn_new)


def note_encoder_forward(note, hn, cn, pp):
    """Single-step forward matching the PyTorch module.
    note: int32 (2,) = [pitch_idx, dur_idx]; hn, cn: (1, 1, H).
    Returns (output (1,1,H), (hn, cn))."""
    h_seq, (hn_new, cn_new) = note_encoder_sequence(note.reshape(1, 2), hn, cn, pp)
    return h_seq.reshape(1, 1, HIDDEN), (hn_new, cn_new)


# ---------------- pure-JAX reference (torch.nn.LSTM single-step semantics) ----------------
def _reference_step(note, h, c, params):
    ep = params["pitch_embedding"][note[0]]
    ed = params["dur_embedding"][note[1]]
    x = jnp.concatenate([ep, ed], axis=-1).reshape(1, INPUT_SIZE)
    gates = (x @ params["weight_ih"].T + params["bias_ih"]
             + h @ params["weight_hh"].T + params["bias_hh"])
    i_g = jax.nn.sigmoid(gates[:, 0:HIDDEN])
    f_g = jax.nn.sigmoid(gates[:, HIDDEN:2 * HIDDEN])
    g_g = jnp.tanh(gates[:, 2 * HIDDEN:3 * HIDDEN])
    o_g = jax.nn.sigmoid(gates[:, 3 * HIDDEN:4 * HIDDEN])
    c_new = f_g * c + i_g * g_g
    h_new = o_g * jnp.tanh(c_new)
    return h_new, c_new


def _init_params(key):
    ks = jax.random.split(key, 6)
    scale = 0.1
    return {
        "pitch_embedding": scale * jax.random.normal(ks[0], (PITCH_INPUT_SIZE, PITCH_EMB), jnp.float32),
        "dur_embedding":   scale * jax.random.normal(ks[1], (DUR_INPUT_SIZE, DUR_EMB), jnp.float32),
        "weight_ih":       scale * jax.random.normal(ks[2], (4 * HIDDEN, INPUT_SIZE), jnp.float32),
        "weight_hh":       scale * jax.random.normal(ks[3], (4 * HIDDEN, HIDDEN), jnp.float32),
        "bias_ih":         scale * jax.random.normal(ks[4], (4 * HIDDEN,), jnp.float32),
        "bias_hh":         scale * jax.random.normal(ks[5], (4 * HIDDEN,), jnp.float32),
    }


if __name__ == "__main__":
    key = jax.random.PRNGKey(0)
    pkey, nkey, hkey, ckey = jax.random.split(key, 4)
    params = _init_params(pkey)
    pp = prepare_params(params)   # one-time table fusion, hoisted off the call path

    T = 8
    k1, k2 = jax.random.split(nkey)
    pitch_idx = jax.random.randint(k1, (T,), 0, PITCH_INPUT_SIZE, dtype=jnp.int32)
    dur_idx = jax.random.randint(k2, (T,), 0, DUR_INPUT_SIZE, dtype=jnp.int32)
    notes = jnp.stack([pitch_idx, dur_idx], axis=-1)      # (T, 2)

    # initHidden() -> zeros(1,1,H); use small random to exercise the recurrence.
    hn = 0.05 * jax.random.normal(hkey, (1, 1, HIDDEN), jnp.float32)
    cn = 0.05 * jax.random.normal(ckey, (1, 1, HIDDEN), jnp.float32)

    # --- single-step (exact module semantics) ---
    out1, (h1, c1) = note_encoder_forward(notes[0], hn, cn, pp)
    jax.block_until_ready((out1, h1, c1))
    h_ref, c_ref = _reference_step(notes[0], hn.reshape(1, HIDDEN), cn.reshape(1, HIDDEN), params)
    assert jnp.allclose(out1.reshape(1, HIDDEN), h_ref, atol=1e-5, rtol=1e-5)
    assert jnp.allclose(h1.reshape(1, HIDDEN), h_ref, atol=1e-5, rtol=1e-5)
    assert jnp.allclose(c1.reshape(1, HIDDEN), c_ref, atol=1e-5, rtol=1e-5)

    # --- full sequence inside one pallas_call (recurrence amortized) ---
    h_seq, (hT, cT) = note_encoder_sequence(notes, hn, cn, pp)
    jax.block_until_ready((h_seq, hT, cT))

    h_r, c_r = hn.reshape(1, HIDDEN), cn.reshape(1, HIDDEN)
    hs = []
    for t in range(T):
        h_r, c_r = _reference_step(notes[t], h_r, c_r, params)
        hs.append(h_r)
    h_seq_ref = jnp.concatenate(hs, axis=0)               # (T, H)

    assert jnp.allclose(h_seq, h_seq_ref, atol=1e-4, rtol=1e-4)
    assert jnp.allclose(hT.reshape(1, HIDDEN), h_r, atol=1e-4, rtol=1e-4)
    assert jnp.allclose(cT.reshape(1, HIDDEN), c_r, atol=1e-4, rtol=1e-4)

    print("KERNEL_OK")
</pallas_src>

<mosaic_0001>
module attributes {stable_mosaic.version = 11 : i64} {
  func.func @note_encoder_seq_kernel(%arg0: i32, %arg1: memref<2x1xi32, #tpu.memory_space<smem>>, %arg2: memref<63x128xf32, #tpu.memory_space<vmem>>, %arg3: memref<20x128xf32, #tpu.memory_space<vmem>>, %arg4: memref<32x128xf32, #tpu.memory_space<vmem>>, %arg5: memref<1x128xf32, #tpu.memory_space<vmem>>, %arg6: memref<1x128xf32, #tpu.memory_space<vmem>>) attributes {dimension_semantics = [#tpu.dimension_semantics<arbitrary>], iteration_bounds = array<i64: 1>, scalar_prefetch = 1 : i64, scratch_operands = 0 : i64, tpu.core_type = #tpu.core_type<tc>, window_params = [{pipeline_mode = #tpu.pipeline_mode<synchronous>, transform_indices = @transform_0, window_bounds = array<i64: 63, 128>}, {pipeline_mode = #tpu.pipeline_mode<synchronous>, transform_indices = @transform_1, window_bounds = array<i64: 20, 128>}, {pipeline_mode = #tpu.pipeline_mode<synchronous>, transform_indices = @transform_2, window_bounds = array<i64: 32, 128>}, {pipeline_mode = #tpu.pipeline_mode<synchronous>, transform_indices = @transform_3, window_bounds = array<i64: 1, 128>}, {pipeline_mode = #tpu.pipeline_mode<synchronous>, transform_indices = @transform_4, window_bounds = array<i64: 1, 128>}]} {
    %c0 = arith.constant 0 : index
    %c0_0 = arith.constant 0 : index
    %0 = vector.load %arg4[%c0, %c0_0] : memref<32x128xf32, #tpu.memory_space<vmem>>, vector<32x128xf32>
    %cst = arith.constant 0.000000e+00 : f32
    %1 = vector.broadcast %cst : f32 to vector<1x64xf32>
    %c0_1 = arith.constant 0 : index
    %c0_2 = arith.constant 0 : index
    %2 = vector.load %arg5[%c0_1, %c0_2] : memref<1x128xf32, #tpu.memory_space<vmem>>, vector<1x32xf32>
    %c0_3 = arith.constant 0 : index
    %c32 = arith.constant 32 : index
    %3 = vector.load %arg5[%c0_3, %c32] : memref<1x128xf32, #tpu.memory_space<vmem>>, vector<1x32xf32>
    %c0_i32 = arith.constant 0 : i32
    %c0_4 = arith.constant 0 : index
    %4 = arith.index_cast %c0_i32 : i32 to index
    %5 = memref.load %arg1[%c0_4, %4] : memref<2x1xi32, #tpu.memory_space<smem>>
    %c1 = arith.constant 1 : index
    %6 = arith.index_cast %c0_i32 : i32 to index
    %7 = memref.load %arg1[%c1, %6] : memref<2x1xi32, #tpu.memory_space<smem>>
    %8 = arith.index_cast %5 : i32 to index
    %c0_5 = arith.constant 0 : index
    %9 = vector.load %arg2[%8, %c0_5] : memref<63x128xf32, #tpu.memory_space<vmem>>, vector<1x128xf32>
    %10 = arith.index_cast %7 : i32 to index
    %c0_6 = arith.constant 0 : index
    %11 = vector.load %arg3[%10, %c0_6] : memref<20x128xf32, #tpu.memory_space<vmem>>, vector<1x128xf32>
    %12 = arith.addf %9, %11 : vector<1x128xf32>
    %cst_7 = arith.constant dense<0.000000e+00> : vector<1x128xf32>
    %13 = tpu.matmul %2, %0, %cst_7 {dimension_numbers = #tpu.dot_dimension_numbers<[1], [0], [0], [1], [0, 0, 1, 1], [], []>} : vector<1x32xf32>, vector<32x128xf32>, vector<1x128xf32> -> vector<1x128xf32>
    %14 = arith.addf %12, %13 : vector<1x128xf32>
    %15 = arith.negf %14 : vector<1x128xf32>
    %16 = math.exp %15 : vector<1x128xf32>
    %cst_8 = arith.constant 1.000000e+00 : f32
    %17 = vector.broadcast %cst_8 : f32 to vector<1x128xf32>
    %18 = arith.addf %17, %16 : vector<1x128xf32>
    %19 = arith.divf %17, %18 : vector<1x128xf32>
    %20 = math.tanh %14 : vector<1x128xf32>
    %21 = vector.extract_strided_slice %19 {offsets = [0, 0], sizes = [1, 32], strides = [1, 1]} : vector<1x128xf32> to vector<1x32xf32>
    %22 = vector.extract_strided_slice %19 {offsets = [0, 32], sizes = [1, 32], strides = [1, 1]} : vector<1x128xf32> to vector<1x32xf32>
    %23 = vector.extract_strided_slice %20 {offsets = [0, 64], sizes = [1, 32], strides = [1, 1]} : vector<1x128xf32> to vector<1x32xf32>
    %24 = vector.extract_strided_slice %19 {offsets = [0, 96], sizes = [1, 32], strides = [1, 1]} : vector<1x128xf32> to vector<1x32xf32>
    %25 = arith.mulf %22, %3 : vector<1x32xf32>
    %26 = arith.mulf %21, %23 : vector<1x32xf32>
    %27 = arith.addf %25, %26 : vector<1x32xf32>
    %28 = math.tanh %27 : vector<1x32xf32>
    %29 = arith.mulf %24, %28 : vector<1x32xf32>
    %30 = tpu.concatenate %29, %27, %1 in 1 : vector<1x32xf32>, vector<1x32xf32>, vector<1x64xf32> -> vector<1x128xf32>
    %31 = arith.index_cast %c0_i32 : i32 to index
    %c0_9 = arith.constant 0 : index
    %32 = vector.load %arg6[%31, %c0_9] : memref<1x128xf32, #tpu.memory_space<vmem>>, vector<1x128xf32>
    tpu.vector_store %arg6[%31, %c0_9], %30 {strides = array<i32>} : memref<1x128xf32, #tpu.memory_space<vmem>>, vector<1x128xf32>,
    %c1_i32 = arith.constant 1 : i32
    return
  }
  func.func @transform_0(%arg0: i32, %arg1: memref<2x1xi32, #tpu.memory_space<smem>>) -> (i32, i32) {
    %c0_i32 = arith.constant 0 : i32
    %c0_i32_0 = arith.constant 0 : i32
    %c0_i32_1 = arith.constant 0 : i32
    return %c0_i32, %c0_i32_0 : i32, i32
  }
  func.func @transform_1(%arg0: i32, %arg1: memref<2x1xi32, #tpu.memory_space<smem>>) -> (i32, i32) {
    %c0_i32 = arith.constant 0 : i32
    %c0_i32_0 = arith.constant 0 : i32
    %c0_i32_1 = arith.constant 0 : i32
    return %c0_i32, %c0_i32_0 : i32, i32
  }
  func.func @transform_2(%arg0: i32, %arg1: memref<2x1xi32, #tpu.memory_space<smem>>) -> (i32, i32) {
    %c0_i32 = arith.constant 0 : i32
    %c0_i32_0 = arith.constant 0 : i32
    %c0_i32_1 = arith.constant 0 : i32
    return %c0_i32, %c0_i32_0 : i32, i32
  }
  func.func @transform_3(%arg0: i32, %arg1: memref<2x1xi32, #tpu.memory_space<smem>>) -> (i32, i32) {
    %c0_i32 = arith.constant 0 : i32
    %c0_i32_0 = arith.constant 0 : i32
    %c0_i32_1 = arith.constant 0 : i32
    return %c0_i32, %c0_i32_0 : i32, i32
  }
  func.func @transform_4(%arg0: i32, %arg1: memref<2x1xi32, #tpu.memory_space<smem>>) -> (i32, i32) {
    %c0_i32 = arith.constant 0 : i32
    %c0_i32_0 = arith.constant 0 : i32
    %c0_i32_1 = arith.constant 0 : i32
    return %c0_i32, %c0_i32_0 : i32, i32
  }
}

</mosaic_0001>

<bundles_post_ra>
// kernel: tpu_custom_call.1
= control target key start
LH: loop header
LB: loop body
LE: loop exit
PB: predicated region body
PF: predicated region fallthrough
CT: control target
= control target key end

     0   :  { %s312_s21 = smov [#allocation3]   ;;  %s371_s0 = inlined_call_operand.vmem [shape: s32[2,1], index: 0, kind: input, shape index: {}]   ;;  %s372_s1 = inlined_call_operand.hbm [shape: f32[63,128], index: 1, kind: input, shape index: {}]   ;;  %s373_s2 = inlined_call_operand.hbm [shape: f32[20,128], index: 2, kind: input, shape index: {}]   ;;  %s374_s3 = inlined_call_operand.hbm [shape: f32[32,128], index: 3, kind: input, shape index: {}]   ;;  %s375_s4 = inlined_call_operand.vmem [shape: f32[1,128], index: 4, kind: input, shape index: {}]   ;;  %s376_s5 = inlined_call_operand.hbm [shape: f32[1,128], index: 5, kind: output, shape index: {}]  }
   0x1   :  { %s11_s20 = sshll.u32 %s371_s0, 4  ;;  %s12_s20 = int_to_ptr.vmem [resolvable:$true] %s11_s20 }
   0x2   :  { %14 = dma.vmem_to_smem %s12_s20, 32, %s312_s21, [#allocation2] }
   0x3   :  { %304 = dma.done.wait [#allocation2], 32 }
   0x4   :  { %305 = vsyncadd [#allocation2], 4294967264 }
   0x5   :  { %17 = sfence }
   0x6   :  { %18 = vsyncpa [#allocation5], 0 }
   0x7   :  { %19 = vsyncpa [#allocation8], 0 }
   0x8   :  { %20 = vsyncpa [#allocation6], 0  ;;  %s38_s24 = sshll.u32 %s373_s2, 4  ;;  %s313_s25 = smov [#allocation7]   ;;  %s39_s24 = int_to_ptr.hbm [resolvable:$true] %s38_s24 }
   0x9   :  { %s40_s26 = sshll.u32 %s313_s25, 4  ;;  %s25_s0 = sshll.u32 %s372_s1, 4  ;;  %s41_s26 = int_to_ptr.vmem [resolvable:$true] %s40_s26  ;;  %s26_s0 = int_to_ptr.hbm [resolvable:$true] %s25_s0 }
   0xa   :  { %s314_s29 = smov 128   ;;  %s315_s30 = smov 8  }
   0xb   :  { %46 = dma.hbm_to_vmem [thread:$0]  %s39_s24, 384, %s41_s26, [#allocation8], %s314_s29, %s314_s29, %s315_s30  }
   0xc   :  { %s316_s6 = smov [#allocation4]   ;;  %s51_s10 = sshll.u32 %s374_s3, 4  ;;  %s52_s10 = int_to_ptr.hbm [resolvable:$true] %s51_s10 }
   0xd   :  { %s27_s7 = sshll.u32 %s316_s6, 4  ;;  %s317_s2 = smov [#allocation9]   ;;  %s28_s7 = int_to_ptr.vmem [resolvable:$true] %s27_s7 }
   0xe   :  { %33 = dma.hbm_to_vmem [thread:$0]  %s26_s0, 1024, %s28_s7, [#allocation5], %s314_s29, %s314_s29, %s315_s30  }
   0xf   :  { %s53_s11 = sshll.u32 %s317_s2, 4  ;;  %s54_s11 = int_to_ptr.vmem [resolvable:$true] %s53_s11 }
  0x10   :  { %59 = dma.hbm_to_vmem [thread:$0]  %s52_s10, 512, %s54_s11, [#allocation8], %s314_s29, %s314_s29, %s315_s30  }
  0x11   :  { %306 = dma.done.wait [#allocation5], 1024  }
  0x12   :  { %307 = vsyncadd [#allocation5], 4294966272 }
  0x13   :  { %308 = dma.done.wait [#allocation8], 896  }
  0x14   :  { %309 = vsyncadd [#allocation8], 4294966400  ;;  %v77_v0 = vld [vmem:[#allocation9 + $0x18] sm:$0xff]  ;;  %v76_v1 = vld [vmem:[#allocation9 + $0x10] sm:$0xff]  ;;  %vm86_vm0 = vcmask 261120   ;;  %s79_s12 = sld [smem:[#allocation3]] }
  0x15   :  { %102 = vmatpush.msra.mxu0 %v77_v0  ;;  %v75_v2 = vld [vmem:[#allocation9 + $0x8] sm:$0xff]  ;;  %v74_v3 = vld [vmem:[#allocation9] sm:$0xff]  ;;  %s176_s13 = sld [smem:[#allocation3 + $0x80]]  ;;  %s318_s16 = smov 64   ;;  %vm153_vm5 = vcmask 523264  }
  0x16   :  { %v78_v4 = vld [vmem:[%s375_s4] sm:$0x1]  ;;  %s319_s4 = smov 32   ;;  %s320_s17 = smov [#allocation10]  }
  0x17   :  { %103 = vmatpush.msra.mxu0 %v76_v1  ;;  %s161_s18 = sshll.u32 %s320_s17, 4  ;;  %s163_s21 = sshll.u32 %s376_s5, 4  ;;  %s162_s18 = int_to_ptr.vmem [resolvable:$true] %s161_s18  ;;  %s164_s21 = int_to_ptr.hbm [resolvable:$true] %s163_s21 }
  0x19   :  { %104 = vmatpush.msra.mxu0 %v75_v2 }
  0x1a   :  { %s81_s14 = scalar_lea.vmem [#allocation4], %s79_s12 }
  0x1b   :  { %105 = vmatpush.msra.mxu0 %v74_v3  ;;  %v82_v5 = vld [vmem:[%s81_s14] sm:$0x1]  ;;  %s83_s15 = scalar_lea.vmem [#allocation7], %s176_s13 }
  0x1c   :  { %177 = vmatmul.msk.f32.vlgmr.msra.gmra.mxu0 %vm86_vm0, %v78_v4  ;;  %v84_v6 = vld [vmem:[%s83_s15] sm:$0x1] }
  0x1d   :  { %v85_v7 = vadd.f32 %v84_v6, %v82_v5 }
  0x99   :  { %v107_v8 = vpop.f32.mrf.mxu0 }
  0x9a   :  { %v110_v9 = vadd.f32 %v107_v8, %v85_v7 }
  0x9c   :  { %188 = vtanh.f32 %v110_v9  ;;  %v178_v11 = vmul.f32 -1.442695, %v110_v9 }
  0x9e   :  { %190 = vpow2.f32 %v178_v11 }
  0xa2   :  { %v189_v10 = vpop.eup %188 }
  0xa3   :  { %133 = vrot.lane.b32.xlu0 %v189_v10, %s318_s16 }
  0xa4   :  { %v191_v12 = vpop.eup %190 }
  0xa5   :  { %v114_v13 = vadd.f32 1.0, %v191_v12 }
  0xa7   :  { %192 = vrcp.f32 %v114_v13  ;;  %v126_v19 = vand.u32 2147483648, %v114_v13  ;;  %vm120_vm2 = vweird.f32 %v114_v13  ;;  %v124_v20 = vand.u32 2147483647, %v114_v13 }
  0xa9   :  { %v127_v22 = vor.u32 1.1754944e-38, %v126_v19  ;;  %vm125_vm4 = vcmp.eq.f32.partialorder %v124_v20, 8.507059e+37 }
  0xad   :  { %v193_v14 = vpop.eup %192 }
  0xae   :  { %v116_v15 = vmul.f32 %v193_v14, %v114_v13  ;;  %vm121_vm1 = vweird.f32 %v193_v14 }
  0xaf   :  { %vm122_vm3 = vmor %vm120_vm2, %vm121_vm1 }
  0xb0   :  { %v117_v16 = vsub.f32 1.0, %v116_v15 }
  0xb2   :  { %v118_v17 = vmul.f32 %v193_v14, %v117_v16 }
  0xb4   :  { %v119_v18 = vadd.f32 %v193_v14, %v118_v17 }
  0xb6   :  { %v123_v21 = vsel %vm122_vm3, %v193_v14, %v119_v18 }
  0xb7   :  { %v128_v24 = vsel %vm125_vm4, %v127_v22, %v123_v21 }
  0xb8   :  { %v131_v26 = vmul.f32 %v128_v24, %v78_v4 }
 0x115   :  { %v134_v23 = vpop.permute.xlu0 %133 }
 0x116   :  { %v136_v25 = vmul.f32 %v134_v23, %v128_v24 }
 0x118   :  { %138 = vrot.lane.b32.xlu0 %v136_v25, %s319_s4 }
 0x18a   :  { %v139_v27 = vpop.permute.xlu0 %138 }
 0x18b   :  { %v141_v28 = vadd.f32 %v139_v27, %v131_v26 }
 0x18d   :  { %194 = vtanh.f32 %v141_v28 }
 0x193   :  { %v195_v29 = vpop.eup %194 }
 0x194   :  { %144 = vrot.lane.b32.xlu1 %v195_v29, %s318_s16 }
 0x206   :  { %v145_v30 = vpop.permute.xlu1 %144 }
 0x207   :  { %v147_v31 = vmul.f32 %v145_v30, %v128_v24 }
 0x209   :  { %149 = vrot.lane.b32.xlu1 %v147_v31, %s319_s4 }
 0x27b   :  { %v150_v32 = vpop.permute.xlu1 %149 }
 0x27c   :  { %v152_v33 = vsel %vm86_vm0, %v150_v32, %v141_v28 }
 0x27d   :  { %v154_v34 = vsel %vm153_vm5, %v152_v33, 0.0 }
 0x27e   :  { %155 = vst [vmem:[#allocation10] sm:$0x1] %v154_v34 }
 0x27f   :  { %166 = dma.vmem_to_hbm [thread:$0]  %s162_s18, 16, %s164_s21, [#allocation6]  }
 0x280   :  { %310 = dma.done.wait [#allocation6], 16  }
 0x281   :  { %311 = vsyncadd [#allocation6], 4294967280 }
 0x282   :  { %171 = vsyncpa [#allocation5], 1 }
 0x283   :  { %172 = vsyncpa [#allocation8], 1 }
 0x284   :  { %173 = vsyncpa [#allocation6], 1 }

</bundles_post_ra>
